<compile_context>
chip_gen: v6e
topology: v6e:2x2x1
jax: 0.10.0
libtpu: 0.0.40
codegen_flags: <defaults>
</compile_context>

<pallas_src>
import jax
import jax.numpy as jnp
from jax.experimental import pallas as pl
from jax.experimental.pallas import tpu as pltpu

_LANES = 128
_SUBLANES = 8


def _colsq_kernel(d_ref, out_ref, acc_ref):
    """Accumulate per-column sum of squares over streamed row tiles."""
    j = pl.program_id(1)  # reduction (row-tile) axis — marked "arbitrary"

    @pl.when(j == 0)
    def _():
        acc_ref[...] = jnp.zeros_like(acc_ref)

    x = d_ref[...].astype(jnp.float32)          # per-tile upcast; f32 accumulation
    acc_ref[...] += jnp.sum(x * x, axis=0, keepdims=True)   # (1, kc)

    @pl.when(j == pl.num_programs(1) - 1)
    def _():
        out_ref[0] = acc_ref[...]               # out_ref is (1, 1, kc)


def d_constraint1(d: jax.Array, *, tile_rows: int = 512, num_shards: int = 2) -> jax.Array:
    """Returns 0.001 * ||(d.T @ d) * I - I||_F as an f32 scalar."""
    n, k = d.shape

    # Lane-dense fold: pack `fold` consecutive rows into one 128-wide row when
    # K divides 128 so each vreg/DMA row is fully occupied.
    fold = _LANES // k if (k < _LANES and _LANES % k == 0) else 1
    kc = k * fold

    # Pad rows (with zeros — they add nothing to the sums) so the fold is exact.
    n_pad = -(-n // fold) * fold
    if n_pad != n:
        d = jnp.pad(d, ((0, n_pad - n), (0, 0)))
    d2 = d.reshape(n_pad // fold, kc)
    n2 = d2.shape[0]

    # Row tile: multiple of 8 sublanes, capped so double-buffered tiles stay
    # small even for v7x's 64 MiB VMEM (512 x 128 x 4B = 256 KiB per buffer).
    tr = min(tile_rows, -(-n2 // _SUBLANES) * _SUBLANES)
    tiles_per_shard = max(1, -(-n2 // (tr * num_shards)))
    n2_pad = num_shards * tiles_per_shard * tr
    if n2_pad != n2:
        d2 = jnp.pad(d2, ((0, n2_pad - n2), (0, 0)))

    partial = pl.pallas_call(
        _colsq_kernel,
        out_shape=jax.ShapeDtypeStruct((num_shards, 1, kc), jnp.float32),
        grid_spec=pltpu.PrefetchScalarGridSpec(
            num_scalar_prefetch=0,
            grid=(num_shards, tiles_per_shard),
            in_specs=[
                pl.BlockSpec((tr, kc), lambda p, i: (p * tiles_per_shard + i, 0)),
            ],
            out_specs=pl.BlockSpec((1, 1, kc), lambda p, i: (p, 0, 0)),
            scratch_shapes=[pltpu.VMEM((1, kc), jnp.float32)],
        ),
        compiler_params=pltpu.CompilerParams(
            dimension_semantics=("parallel", "arbitrary"),
        ),
    )(d2)

    # Tiny O(K) epilogue: combine shard partials, undo the lane fold, then
    # ||diag(d^T d) - 1||_2  ==  ||(d^T d) * I - I||_F.
    colsq = partial.sum(axis=(0, 1)).reshape(fold, k).sum(axis=0)   # (K,)
    return 0.001 * jnp.sqrt(jnp.sum((colsq - 1.0) ** 2))


def _reference(d: jax.Array) -> jax.Array:
    d = d.astype(jnp.float32)
    k = d.shape[1]
    eye = jnp.eye(k, dtype=jnp.float32)
    gram = jnp.dot(d.T, d, precision=jax.lax.Precision.HIGHEST)
    return 0.001 * jnp.linalg.norm(gram * eye - eye)


if __name__ == "__main__":
    key = jax.random.PRNGKey(0)

    # EDESC-style D matrix: N feature rows x K subspace basis columns.
    N, K = 128, 32
    d = jax.random.normal(key, (N, K), dtype=jnp.float32)
    loss = d_constraint1(d)
    jax.block_until_ready(loss)
    ref = _reference(d)
    assert jnp.allclose(loss, ref, rtol=1e-4, atol=1e-6), (loss, ref)

    # Exercises the padding / no-lane-fold path (K does not divide 128).
    d_odd = jax.random.normal(jax.random.PRNGKey(1), (100, 20), dtype=jnp.float32)
    loss_odd = d_constraint1(d_odd)
    jax.block_until_ready(loss_odd)
    ref_odd = _reference(d_odd)
    assert jnp.allclose(loss_odd, ref_odd, rtol=1e-4, atol=1e-6), (loss_odd, ref_odd)

    print("KERNEL_OK")
</pallas_src>

<mosaic_0001>
module attributes {stable_mosaic.version = 11 : i64} {
  func.func @_colsq_kernel(%arg0: i32, %arg1: i32, %arg2: memref<32x128xf32, #tpu.memory_space<vmem>>, %arg3: memref<1x1x128xf32, #tpu.memory_space<vmem>>, %arg4: memref<1x128xf32, #tpu.memory_space<vmem>>) attributes {dimension_semantics = [#tpu.dimension_semantics<parallel>, #tpu.dimension_semantics<arbitrary>], iteration_bounds = array<i64: 2, 1>, scalar_prefetch = 0 : i64, scratch_operands = 1 : i64, tpu.core_type = #tpu.core_type<tc>, window_params = [{transform_indices = @transform_0, window_bounds = array<i64: 32, 128>}, {transform_indices = @transform_1, window_bounds = array<i64: 1, 1, 128>}]} {
    %c0_i32 = arith.constant 0 : i32
    %0 = arith.cmpi eq, %arg1, %c0_i32 : i32
    %1 = arith.extui %0 : i1 to i32
    %c0_i32_0 = arith.constant 0 : i32
    %2 = arith.cmpi ne, %1, %c0_i32_0 : i32
    scf.if %2 {
      %cst_8 = arith.constant 0.000000e+00 : f32
      %13 = vector.broadcast %cst_8 : f32 to vector<1x128xf32>
      %c0_9 = arith.constant 0 : index
      %c0_10 = arith.constant 0 : index
      %14 = vector.load %arg4[%c0_9, %c0_10] : memref<1x128xf32, #tpu.memory_space<vmem>>, vector<1x128xf32>
      tpu.vector_store %arg4[%c0_9, %c0_10], %13 {strides = array<i32>} : memref<1x128xf32, #tpu.memory_space<vmem>>, vector<1x128xf32>,
    } else {
    }
    %c0 = arith.constant 0 : index
    %c0_1 = arith.constant 0 : index
    %3 = vector.load %arg2[%c0, %c0_1] : memref<32x128xf32, #tpu.memory_space<vmem>>, vector<32x128xf32>
    %c0_2 = arith.constant 0 : index
    %c0_3 = arith.constant 0 : index
    %4 = vector.load %arg4[%c0_2, %c0_3] : memref<1x128xf32, #tpu.memory_space<vmem>>, vector<1x128xf32>
    %5 = arith.mulf %3, %3 : vector<32x128xf32>
    %cst = arith.constant dense<0.000000e+00> : vector<128xf32>
    %6 = vector.multi_reduction <add>, %5, %cst [0] : vector<32x128xf32> to vector<128xf32>
    %7 = vector.shape_cast %6 : vector<128xf32> to vector<1x128xf32>
    %8 = arith.addf %4, %7 : vector<1x128xf32>
    %c0_4 = arith.constant 0 : index
    %c0_5 = arith.constant 0 : index
    %9 = vector.load %arg4[%c0_4, %c0_5] : memref<1x128xf32, #tpu.memory_space<vmem>>, vector<1x128xf32>
    tpu.vector_store %arg4[%c0_4, %c0_5], %8 {strides = array<i32>} : memref<1x128xf32, #tpu.memory_space<vmem>>, vector<1x128xf32>,
    %c0_i32_6 = arith.constant 0 : i32
    %10 = arith.cmpi eq, %arg1, %c0_i32_6 : i32
    %11 = arith.extui %10 : i1 to i32
    %c0_i32_7 = arith.constant 0 : i32
    %12 = arith.cmpi ne, %11, %c0_i32_7 : i32
    scf.if %12 {
      %c0_8 = arith.constant 0 : index
      %c0_9 = arith.constant 0 : index
      %13 = vector.load %arg4[%c0_8, %c0_9] : memref<1x128xf32, #tpu.memory_space<vmem>>, vector<1x128xf32>
      %c0_10 = arith.constant 0 : index
      %c0_11 = arith.constant 0 : index
      %c0_12 = arith.constant 0 : index
      %14 = vector.load %arg3[%c0_10, %c0_11, %c0_12] : memref<1x1x128xf32, #tpu.memory_space<vmem>>, vector<1x1x128xf32>
      %15 = vector.shape_cast %14 : vector<1x1x128xf32> to vector<1x128xf32>
      %16 = vector.shape_cast %13 : vector<1x128xf32> to vector<1x1x128xf32>
      tpu.vector_store %arg3[%c0_10, %c0_11, %c0_12], %16 {strides = array<i32>} : memref<1x1x128xf32, #tpu.memory_space<vmem>>, vector<1x1x128xf32>,
    } else {
    }
    return
  }
  func.func @transform_0(%arg0: i32, %arg1: i32) -> (i32, i32) {
    %c1_i32 = arith.constant 1 : i32
    %0 = arith.muli %arg0, %c1_i32 : i32
    %1 = arith.addi %0, %arg1 : i32
    %c0_i32 = arith.constant 0 : i32
    %c0_i32_0 = arith.constant 0 : i32
    return %1, %c0_i32 : i32, i32
  }
  func.func @transform_1(%arg0: i32, %arg1: i32) -> (i32, i32, i32) {
    %c0_i32 = arith.constant 0 : i32
    %c0_i32_0 = arith.constant 0 : i32
    %c0_i32_1 = arith.constant 0 : i32
    return %arg0, %c0_i32, %c0_i32_0 : i32, i32, i32
  }
}

</mosaic_0001>

<bundles_post_ra>
// kernel: tpu_custom_call.1
= control target key start
LH: loop header
LB: loop body
LE: loop exit
PB: predicated region body
PF: predicated region fallthrough
CT: control target
= control target key end

     0   :  { %6 = vsyncpa [#allocation4], 0  ;;  %s611_s0 = inlined_call_operand.hbm [shape: f32[64,128], index: 0, kind: input, shape index: {}]   ;;  %s612_s1 = inlined_call_operand.hbm [shape: f32[2,1,128], index: 1, kind: output, shape index: {}]  }
   0x1   :  { %8 = vsyncpa [#allocation4 + $0x1], 0 }
   0x2   :  { %9 = vsyncpa [#allocation5], 0 }
   0x3   :  { %11 = vsyncpa [#allocation5 + $0x1], 0  ;;  %s472_s6 = smov 0   ;;  %s474_s7 = smov 0  }
   0x4   :  { %s476_s8 = smov 0   ;;  %s478_s9 = smov 0  }
   0x5   :  { %s480_s10 = smov 0   ;;  %s482_s11 = smov 0  }
   0x6 LB: > { %s269_s12 = sadd.s32 4294967295, %s455_s11   ;;  %s270_s13 = sadd.s32 4294967294, %s455_s11   ;;  %s455_s11 = sphi %s482_s11, %s17_s11   ;;  %s451_s10 = sphi %s480_s10, %s623_s10   ;;  %s447_s9 = sphi %s478_s9, %s622_s9   ;;  %s443_s8 = sphi %s476_s8, %s621_s8   ;;  %s439_s7 = sphi %s474_s7, %s620_s7   ;;  %s435_s6 = sphi %s472_s6, %s619_s6  }
   0x7   : > { %s29_s14 = sadd.s32 1, %s451_s10  ;;  %s38_s15 = sadd.s32 1, %s443_s8 }
   0x8   : > { %p31_p0 = scmp.ge.s32.totalorder %s29_s14, 2  ;;  %p45_p1 = scmp.ne.s32.totalorder %s443_s8, %s439_s7 }
   0x9   : > { %p46_p2 = scmp.eq.s32.totalorder %s455_s11, 0  ;;  %p51_p3 = scmp.ne.s32.totalorder %s439_s7, %s435_s6 }
   0xa   : > { %s625_s14 = smov (%p31_p0, %s29_s14), 0  ;;  %p52_p5 = scmp.eq.s32.totalorder %s269_s12, 0 }
   0xb   : > { %p513_p4 = por %p46_p2, %p45_p1  ;;  %s35_s17 = ssub.s32 %s451_s10, %s625_s14 }
   0xc   : > { %p75_p6 = scmp.eq.s32.totalorder %s269_s12, 1  ;;  %p36_p7 = scmp.eq.s32.totalorder %s35_s17, 0 }
   0xd   : > { %p519_p8 = por %p52_p5, %p51_p3  ;;  %p81_p10 = scmp.eq.s32.totalorder %s270_s13, 1 }
   0xe   : > { %p523_p9 = por %p75_p6, %p45_p1  ;;  %p294_p13 = scmp.lt.s32.totalorder %s455_s11, 2 }
   0xf   : > { %s528_s20 = scalar_select %p36_p7, %s443_s8, %s38_s15  }
  0x10   : > { %p530_p11 = por %p81_p10, %p51_p3  ;;  %s101_s22 = sand.u32 1, %s443_s8  }
  0x11   : > { %s273_s23 = sshll.u32 %s101_s22, 5  ;;  %s281_s24 = sshll.u32 %s451_s10, 9 }
  0x12   : > { %s112_s27 = scalar_lea.hbm %s611_s0, %s281_s24  ;;  %s105_s28 = scalar_lea.vmem [#allocation3], %s273_s23 }
  0x13   : > { %s113_s29 = sshll.u32 %s105_s28, 4  ;;  %p543_p0 = pnand %p294_p13, %p513_p4  ;;  %s114_s29 = int_to_ptr.vmem [resolvable:$true] %s113_s29 }
  0x14   : > { %p276_p1 = scmp.ge.s32.totalorder %s455_s11, 1  ;;  %s102_s2 = scalar_lea.sflag [#allocation4], %s101_s22 }
  0x15   : > { %p349_p2 = pneg %p543_p0  ;;  %s360_s3 = scalar_lea.vmem %s114_s29, 512 }
  0x16   : > { %p361_p3 = scmp.ne.s32.totalorder %s114_s29, %s360_s3  ;;  %s457_s4 = smov [#allocation3]  }
  0x17   : > { %s365_s5 = sshll.u32 %s457_s4, 4  ;;  %s366_s5 = int_to_ptr.vmem [resolvable:$false] %s365_s5 }
  0x18   : > { %p363_p5 = pnand %p361_p3, %p349_p2  ;;  %s367_s12 = scalar_lea.vmem %s366_s5, 1024 }
  0x19   : > { %p368_p7 = scmp.lt.s32.totalorder %s114_s29, %s366_s5  ;;  %p369_p10 = scmp.lt.s32.totalorder %s367_s12, %s360_s3 }
  0x1a   : > { %p364_p6 = pneg %p363_p5 }
  0x1b   : > { %p370_p12 = por %p369_p10, %p368_p7 }
  0x1d   : > { %p371_p4 = pnand %p370_p12, %p364_p6 }
  0x1f   : > { %374 = shalt.err (!%p371_p4)
}
  0x20   : > { %s458_s13 = smov 128   ;;  %s459_s15 = smov 8  }
  0x21   : > { %289 = dma.hbm_to_vmem [thread:$0]  (!%p543_p0), %s112_s27, 512, %s114_s29, %s102_s2, %s458_s13, %s458_s13, %s459_s15  }
  0x22   : > { %p121_p13 = scmp.lt.s32.totalorder %s455_s11, 3 }
  0x24   : > { %p122_p2 = pnand %p276_p1, %p121_p13 }
  0x25   : > { %s556_s16 = sand.u32 (!%p122_p2), 1, %s439_s7  }
  0x26   : > { %125 = sbr.rel (%p122_p2) target bundleno = 88 (0x58), region = 24  ;;  %s277_s17 = sshll.u32 (!%p122_p2), %s556_s16, 5 }
  0x27   : > { %s128_s22 = scalar_lea.sflag (!%p122_p2), [#allocation4], %s556_s16  ;;  %s131_s23 = scalar_lea.vmem (!%p122_p2), [#allocation3], %s277_s17 }
  0x2b   : > { %426 = dma.done.wait (%p519_p8), %s128_s22, 512  }
  0x2c   : > { %428 = vsyncadd (%p519_p8), %s128_s22, 4294966784  ;;  %v460_v0 = vmov 0.0   ;;  %v156_v1 = vld [vmem:[%s131_s23] sm:$0xff]  ;;  %v157_v2 = vld [vmem:[%s131_s23 + $0x8] sm:$0xff]  ;;  %s148_s18 = scalar_lea.vmem [#allocation6], %s556_s16  ;;  %s278_s25 = sshll.u32 %s447_s9, 4 }
  0x2d   : > { %155 = vst [vmem:[#allocation2] sm:$0x1] %v460_v0  ;;  %v158_v3 = vld [vmem:[%s131_s23 + $0x10] sm:$0xff]  ;;  %v159_v4 = vld [vmem:[%s131_s23 + $0x18] sm:$0xff]  ;;  %v161_v5 = vmul.f32 %v156_v1, %v156_v1  ;;  %v162_v6 = vmul.f32 %v157_v2, %v157_v2  ;;  %s194_s24 = sshll.u32 %s148_s18, 4  ;;  %s192_s28 = scalar_lea.hbm %s612_s1, %s278_s25  ;;  %s566_s24 = int_to_ptr.vmem [resolvable:$true] %s194_s24 }
  0x2e   : > { %v163_v7 = vmul.f32 %v158_v3, %v158_v3  ;;  %v164_v8 = vmul.f32 %v159_v4, %v159_v4  ;;  %s182_s29 = scalar_lea.sflag [#allocation5], %s556_s16  ;;  %s375_s30 = scalar_lea.vmem %s566_s24, 16 }
  0x2f   : > { %v165_v9 = vadd.f32 %v162_v6, %v161_v5  ;;  %p376_p8 = scmp.ne.s32.totalorder %s566_s24, %s375_s30  ;;  %s461_s2 = smov [#allocation6]  }
  0x30   : > { %s379_s3 = sshll.u32 %s461_s2, 4  ;;  %s380_s3 = int_to_ptr.vmem [resolvable:$false] %s379_s3 }
  0x31   : > { %v166_v10 = vadd.f32 %v165_v9, %v163_v7  ;;  %p377_p12 = pnand %p376_p8, %p523_p9  ;;  %s381_s9 = scalar_lea.vmem %s380_s3, 32 }
  0x32   : > { %p382_p1 = scmp.lt.s32.totalorder %s566_s24, %s380_s3  ;;  %p383_p3 = scmp.lt.s32.totalorder %s381_s9, %s375_s30 }
  0x33   : > { %v167_v11 = vadd.f32 %v166_v10, %v164_v8  ;;  %p378_p0 = pneg %p377_p12 }
  0x34   : > { %v160_v17 = vld [vmem:[#allocation2] sm:$0x1]  ;;  %p384_p5 = por %p383_p3, %p382_p1 }
  0x35   : > { %v168_v12 = vrot.slane %v167_v11, 4 }
  0x36   : > { %p385_p6 = pnand %p384_p5, %p378_p0 }
  0x37   : > { %v169_v13 = vadd.f32 %v168_v12, %v167_v11 }
  0x39   : > { %v170_v14 = vrot.slane %v169_v13, 2 }
  0x3b   : > { %v171_v15 = vadd.f32 %v170_v14, %v169_v13 }
  0x3d   : > { %v172_v16 = vrot.slane %v171_v15, 1 }
  0x3f   : > { %v173_v18 = vadd.f32 %v172_v16, %v171_v15 }
  0x41   : > { %v174_v19 = vadd.f32 %v173_v18, %v160_v17 }
  0x43   : > { %175 = vst [vmem:[#allocation2] sm:$0x1] %v174_v19 }
  0x4a   : > { %v179_v20 = vld [vmem:[#allocation2] sm:$0x1] }
  0x4b   : > { %180 = vst [vmem:[%s148_s18] sm:$0x1] %v179_v20 }
  0x4c   : > { %388 = shalt.err (!%p385_p6)
}
  0x4d   : > { %s389_s4 = scalar_lea.hbm %s192_s28, 16  ;;  %s393_s13 = scalar_lea.hbm %s612_s1, 32 }
  0x4e   : > { %p390_p7 = scmp.ne.s32.totalorder %s192_s28, %s389_s4  ;;  %p394_p13 = scmp.lt.s32.totalorder %s192_s28, %s612_s1 }
  0x4f   : > { %p395_p2 = scmp.lt.s32.totalorder %s393_s13, %s389_s4 }
  0x50   : > { %p391_p10 = pnand %p390_p7, %p523_p9 }
  0x51   : > { %p396_p8 = por %p395_p2, %p394_p13 }
  0x52   : > { %p392_p4 = pneg %p391_p10 }
  0x54   : > { %p397_p12 = pnand %p396_p8, %p392_p4 }
  0x56   : > { %400 = shalt.err (!%p397_p12)
}
  0x57   : > { %284 = dma.vmem_to_hbm [thread:$0]  (%p523_p9), %s566_s24, 16, %s192_s28, %s182_s29  }
  0x58 PF: > { %s206_s17 = sand.u32 1, %s435_s6   ;;  %p618_p0 = scmp.ge.s32.totalorder %s455_s11, 2 }
  0x59   : > { %s207_s22 = scalar_lea.sflag [#allocation5], %s206_s17 }
  0x5a   : > { %p291_p1 = pnand %p618_p0, %p530_p11 }
  0x5c   : > { %p292_p3 = pneg %p291_p1 }
  0x5e   : > { %430 = dma.done.wait (%p292_p3), %s207_s22, 16  }
  0x5f   : > { %432 = vsyncadd (%p292_p3), %s207_s22, 4294967280  ;;  %s17_s11 = sadd.s32 1, %s455_s11   ;;  %s619_s6 = smov %s439_s7 }
  0x60   : > { %p14_p5 = scmp.ge.s32.totalorder %s17_s11, 4   ;;  %s620_s7 = smov %s443_s8 }
  0x61   : > { %s621_s8 = smov %s528_s20  ;;  %s622_s9 = smov %s451_s10 }
  0x62   : > { %s623_s10 = smov %s625_s14  ;;  %16 = sbr.rel (!%p14_p5) target bundleno = 6 (0x6), region = 77 }
  0x67   :  { %211 = vsyncpa [#allocation4], 1 }
  0x68   :  { %213 = vsyncpa [#allocation4 + $0x1], 1 }
  0x69   :  { %214 = vsyncpa [#allocation5], 1 }
  0x6a   :  { %216 = vsyncpa [#allocation5 + $0x1], 1 }

</bundles_post_ra>
